<compile_context>
chip_gen: v7x
topology: tpu7x:2x2x1
jax: 0.10.0
libtpu: 0.0.40
codegen_flags: <defaults>
</compile_context>

<pallas_src>
import math

import jax
import jax.numpy as jnp
from jax.experimental import pallas as pl
from jax.experimental.pallas import tpu as pltpu


def _sin_kernel(x_ref, scale_ref, o_ref):
    # Elementwise hot path: sin(scale * x), computed in f32 for accuracy.
    # scale is (1, W) float32, resident in VMEM across all grid steps, and
    # broadcasts over the row-tile.
    x = x_ref[...].astype(jnp.float32)
    o_ref[...] = jnp.sin(scale_ref[...] * x).astype(o_ref.dtype)


def _round_up(n, m):
    return ((n + m - 1) // m) * m


def sin_module(x, freq, w_mod=1.0):
    """Pallas equivalent of Sin.forward: sin(w_mod * freq * x).

    x:    (..., dim)
    freq: (1, dim) learned parameter (init = w * ones)
    """
    orig_shape = x.shape
    dim = orig_shape[-1]
    x2 = x.reshape(-1, dim)
    L = x2.shape[0]

    dtype = x.dtype
    itemsize = jnp.dtype(dtype).itemsize
    # Dtype-aware sublane height: 8 (f32), 16 (bf16), 32 (int8/fp8).
    sublane = max(8, 32 // itemsize)

    # Fold w_mod into the per-column scale once, outside the kernel. Keep it
    # in f32 so the in-kernel multiply + sin range reduction stay accurate
    # even for bf16 activations.
    scale = (jnp.float32(w_mod) * freq.astype(jnp.float32)).reshape(1, dim)

    # Lane-dense packing: pack k consecutive rows into one super-row so the
    # last (lane) axis is a multiple of 128 -> full vregs, unmasked stores.
    k = 128 // math.gcd(dim, 128)
    W = k * dim
    scale_packed = jnp.tile(scale, (1, k))  # (1, W), preserves per-column scaling

    # Pad only to a multiple of k (needed for the packing reshape). No
    # tile-rounding pad and no trailing slice for aligned L: the partial last
    # grid block is masked by Pallas.
    rows_packed = pl.cdiv(L, k)
    L_pad = rows_packed * k
    padded = L_pad != L
    if padded:
        x2 = jnp.pad(x2, ((0, L_pad - L), (0, 0)))
    x_packed = x2.reshape(rows_packed, W)

    # Row-tile: ~4 MiB per input tile (double-buffered in+out ~16 MiB VMEM,
    # comfortably under the 32 MiB scoped limit on every generation, incl.
    # v7x's 64 MiB physical VMEM), rounded to the sublane height.
    target_bytes = 4 << 20
    tile_rows = max(sublane, (target_bytes // (W * itemsize)) // sublane * sublane)
    tile_rows = min(tile_rows, _round_up(rows_packed, sublane))
    n_tiles = pl.cdiv(rows_packed, tile_rows)

    # v7x has 2 TensorCores; make sure a large-but-single-tile (or odd-tile)
    # grid splits so the "parallel" axis can shard across both cores.
    if n_tiles % 2 == 1 and rows_packed > 2 * sublane:
        n_even = n_tiles + 1
        tile_rows = max(sublane, _round_up(pl.cdiv(rows_packed, n_even), sublane))
        n_tiles = pl.cdiv(rows_packed, tile_rows)

    out_packed = pl.pallas_call(
        _sin_kernel,
        out_shape=jax.ShapeDtypeStruct((rows_packed, W), dtype),
        grid=(n_tiles,),
        in_specs=[
            pl.BlockSpec((tile_rows, W), lambda i: (i, 0)),  # streaming x tile
            pl.BlockSpec((1, W), lambda i: (0, 0)),          # resident f32 scale
        ],
        out_specs=pl.BlockSpec((tile_rows, W), lambda i: (i, 0)),
        compiler_params=pltpu.CompilerParams(
            dimension_semantics=("parallel",),
            vmem_limit_bytes=32 * 1024 * 1024,
        ),
    )(x_packed, scale_packed)

    out = out_packed.reshape(L_pad, dim)
    if padded:
        out = out[:L]
    return out.reshape(orig_shape)


if __name__ == "__main__":
    # Module config (matches Sin.__init__ defaults): dim=32, w=10, w_mod=1
    dim = 32
    batch = 2
    seq = 8
    w = 10.0
    w_mod = 1.0

    # Deterministic parameter init: freq = w * ones(1, dim)
    freq = w * jnp.ones((1, dim), dtype=jnp.float32)

    # Deterministic example input
    key = jax.random.PRNGKey(0)
    x = jax.random.normal(key, (batch, seq, dim), dtype=jnp.float32)

    out = sin_module(x, freq, w_mod=w_mod)
    out = jax.block_until_ready(out)

    # Reference check (plain JAX)
    ref = jnp.sin(w_mod * freq * x)
    assert out.shape == (batch, seq, dim)
    assert jnp.allclose(out, ref, atol=1e-5, rtol=1e-5)

    print("KERNEL_OK")
</pallas_src>

<mosaic_0001>
module attributes {stable_mosaic.version = 11 : i64} {
  func.func @_sin_kernel(%arg0: i32, %arg1: memref<8x128xf32, #tpu.memory_space<vmem>>, %arg2: memref<1x128xf32, #tpu.memory_space<vmem>>, %arg3: memref<8x128xf32, #tpu.memory_space<vmem>>) attributes {dimension_semantics = [#tpu.dimension_semantics<parallel>], iteration_bounds = array<i64: 1>, scalar_prefetch = 0 : i64, scratch_operands = 0 : i64, tpu.core_type = #tpu.core_type<tc>, window_params = [{transform_indices = @transform_0, window_bounds = array<i64: 8, 128>}, {pipeline_mode = #tpu.pipeline_mode<synchronous>, transform_indices = @transform_1, window_bounds = array<i64: 1, 128>}, {transform_indices = @transform_2, window_bounds = array<i64: 8, 128>}]} {
    %c0 = arith.constant 0 : index
    %c0_0 = arith.constant 0 : index
    %0 = vector.load %arg1[%c0, %c0_0] : memref<8x128xf32, #tpu.memory_space<vmem>>, vector<8x128xf32>
    %c0_1 = arith.constant 0 : index
    %c0_2 = arith.constant 0 : index
    %1 = vector.load %arg2[%c0_1, %c0_2] : memref<1x128xf32, #tpu.memory_space<vmem>>, vector<1x128xf32>
    %2 = vector.broadcast %1 : vector<1x128xf32> to vector<8x128xf32>
    %3 = arith.mulf %2, %0 : vector<8x128xf32>
    %4 = math.sin %3 : vector<8x128xf32>
    %c0_3 = arith.constant 0 : index
    %c0_4 = arith.constant 0 : index
    %5 = vector.load %arg3[%c0_3, %c0_4] : memref<8x128xf32, #tpu.memory_space<vmem>>, vector<8x128xf32>
    tpu.vector_store %arg3[%c0_3, %c0_4], %4 {strides = array<i32>} : memref<8x128xf32, #tpu.memory_space<vmem>>, vector<8x128xf32>,
    return
  }
  func.func @transform_0(%arg0: i32) -> (i32, i32) {
    %c0_i32 = arith.constant 0 : i32
    %c0_i32_0 = arith.constant 0 : i32
    return %arg0, %c0_i32 : i32, i32
  }
  func.func @transform_1(%arg0: i32) -> (i32, i32) {
    %c0_i32 = arith.constant 0 : i32
    %c0_i32_0 = arith.constant 0 : i32
    %c0_i32_1 = arith.constant 0 : i32
    return %c0_i32, %c0_i32_0 : i32, i32
  }
  func.func @transform_2(%arg0: i32) -> (i32, i32) {
    %c0_i32 = arith.constant 0 : i32
    %c0_i32_0 = arith.constant 0 : i32
    return %arg0, %c0_i32 : i32, i32
  }
}

</mosaic_0001>

<bundles_post_ra>
// kernel: tpu_custom_call.1
= control target key start
LH: loop header
LB: loop body
LE: loop exit
PB: predicated region body
PF: predicated region fallthrough
CT: control target
= control target key end

     0   :  { %7 = vsyncpa [#allocation3], 0  ;;  %s307_s0 = inlined_call_operand.hbm [shape: f32[4,128], index: 0, kind: input, shape index: {}]   ;;  %s308_s1 = inlined_call_operand.vmem [shape: f32[1,128], index: 1, kind: input, shape index: {}]   ;;  %s309_s2 = inlined_call_operand.hbm [shape: f32[4,128], index: 2, kind: output, shape index: {}]  }
   0x1   :  { %8 = vsyncpa [#allocation4], 0 }
   0x2   :  { %13 = vsyncadd [#allocation3], 64  ;;  %s228_s9 = smov [#allocation2]   ;;  %s180_s13 = scalar_lea.hbm %s307_s0, 64 }
   0x3   :  { %s14_s10 = sshll.u32 %s228_s9, 4  ;;  %p181_p0 = scmp.ne.s32.totalorder %s307_s0, %s180_s13  ;;  %s15_s10 = int_to_ptr.vmem [resolvable:$true] %s14_s10 }
   0x4   :  { %p184_p1 = scmp.lt.u32.totalorder %s180_s13, %s307_s0 }
   0x6   :  { %p186_p2 = pnand %p184_p1, %p181_p0 }
   0x8   :  { %189 = shalt.err (!%p186_p2)
}
   0x9   :  { %s190_s18 = scalar_lea.vmem %s15_s10, 64  ;;  %s194_s19 = scalar_lea.vmem %s15_s10, 128 }
   0xa   :  { %p191_p3 = scmp.ne.s32.totalorder %s15_s10, %s190_s18  ;;  %p195_p4 = scmp.lt.s32.totalorder %s15_s10, %s15_s10 }
   0xb   :  { %p196_p5 = scmp.lt.s32.totalorder %s194_s19, %s190_s18 }
   0xd   :  { %p197_p6 = por %p196_p5, %p195_p4 }
   0xf   :  { %p198_p7 = pnand %p197_p6, %p191_p3 }
  0x11   :  { %201 = shalt.err (!%p198_p7)
}
  0x12   :  { %s229_s20 = smov 64   ;;  %s230_s21 = smov 4  }
  0x13   :  { %20 = dma.hbm_to_vmem [thread:$0]  %s307_s0, 64, %s15_s10, [#allocation3], %s229_s20, %s229_s20, %s230_s21  }
  0x14   :  { %224 = dma.done.wait [#allocation3], 128  }
  0x15   :  { %225 = vsyncadd [#allocation3], 4294967168  ;;  %v26_v0 = vld [vmem:[#allocation2] sm:$0xff]  ;;  %v231_v14 = vmov 683565275  }
  0x16   :  { %v157_v1 = vld [vmem:[%s308_s1] ss:$0 sm:$0xff]  ;;  %v232_v16 = vmov 2475754826   ;;  %v233_v18 = vmov 2131351028  }
  0x17   :  { %v271_v2 = vmul.f32 %v157_v1, %v26_v0  ;;  %v234_v20 = vmov 2102212464   ;;  %v235_v22 = vmov 920167782   ;;  %v236_v29 = vmov 1326507024  }
  0x19   :  { %v38_v3 = vand.u32 2139095040, %v271_v2  ;;  %v35_v5 = vand.u32 2147483647, %v271_v2  ;;  %vm37_vm7 = vcmp.lt.s32.totalorder %v271_v2, 0  ;;  %vm127_vm12 = vweird.f32 %v271_v2 }
  0x1b   :  { %v39_v4 = vshrl.u32 %v38_v3, 23  ;;  %v42_v8 = vand.u32 8388607, %v35_v5  ;;  %vm36_vm8 = vcmp.le.f32.partialorder %v35_v5, 0.7853982 }
  0x1d   :  { %v158_v6 = vadd.s32 4294967169, %v39_v4  ;;  %v43_v11 = vor.u32 8388608, %v42_v8 }
  0x1f   :  { %v45_v7 = vadd.s32 1, %v158_v6  ;;  %v83_v31 = vshll.u32 %v43_v11, 8 }
  0x21   :  { %vm46_vm0 = vcmp.gt.s32.totalorder %v45_v7, 0 }
  0x22   :  { %v47_v9 = vsel %vm46_vm0, %v45_v7, 0 }
  0x23   :  { %v49_v10 = vand.u32 31, %v47_v9  ;;  %v48_v12 = vshrl.u32 %v47_v9, 5 }
  0x25   :  { %v50_v13 = vsub.s32 32, %v49_v10  ;;  %v52_v15 = vshll.u32 %v231_v14, %v49_v10  ;;  %v55_v17 = vshll.u32 %v232_v16, %v49_v10  ;;  %v58_v19 = vshll.u32 %v233_v18, %v49_v10 }
  0x26   :  { %v61_v21 = vshll.u32 %v234_v20, %v49_v10  ;;  %v64_v23 = vshll.u32 %v235_v22, %v49_v10  ;;  %vm67_vm1 = vcmp.lt.s32.totalorder %v48_v12, 1  ;;  %vm70_vm2 = vcmp.lt.s32.totalorder %v48_v12, 4 }
  0x27   :  { %v51_v24 = vshrl.u32 %v231_v14, %v50_v13  ;;  %v53_v25 = vshrl.u32 %v232_v16, %v50_v13  ;;  %v56_v26 = vshrl.u32 %v233_v18, %v50_v13  ;;  %v59_v27 = vshrl.u32 %v234_v20, %v50_v13 }
  0x28   :  { %v62_v28 = vshrl.u32 %v235_v22, %v50_v13  ;;  %v65_v30 = vshrl.u32 %v236_v29, %v50_v13  ;;  %vm68_vm3 = vcmp.lt.s32.totalorder %v48_v12, 2  ;;  %vm69_vm4 = vcmp.lt.s32.totalorder %v48_v12, 3 }
  0x29   :  { %v54_v32 = vor.u32 %v53_v25, %v52_v15  ;;  %v57_v33 = vor.u32 %v56_v26, %v55_v17  ;;  %v60_v34 = vor.u32 %v59_v27, %v58_v19 }
  0x2a   :  { %v63_v35 = vor.u32 %v62_v28, %v61_v21  ;;  %v66_v36 = vor.u32 %v65_v30, %v64_v23 }
  0x2b   :  { %v71_v37 = vsel %vm67_vm1, %v51_v24, %v54_v32  ;;  %v72_v38 = vsel %vm70_vm2, %v60_v34, 2102212464  ;;  %v75_v39 = vsel %vm67_vm1, %v54_v32, %v57_v33  ;;  %v79_v40 = vsel %vm67_vm1, %v57_v33, %v60_v34 }
  0x2c   :  { %v73_v41 = vsel %vm69_vm4, %v57_v33, %v72_v38  ;;  %v76_v42 = vsel %vm70_vm2, %v63_v35, 920167782  ;;  %v80_v43 = vsel %vm70_vm2, %v66_v36, 1326507024 }
  0x2d   :  { %v77_v44 = vsel %vm69_vm4, %v60_v34, %v76_v42  ;;  %v81_v45 = vsel %vm69_vm4, %v63_v35, %v80_v43  ;;  %v74_v46 = vsel %vm68_vm3, %v71_v37, %v73_v41 }
  0x2e   :  { %v78_v47 = vsel %vm68_vm3, %v75_v39, %v77_v44  ;;  %v82_v48 = vsel %vm68_vm3, %v79_v40, %v81_v45  ;;  %v90_v53 = vmul.u32 %v83_v31, %v74_v46 }
  0x2f   :  { %v277_v49 = vmul.u32.u64.low %v83_v31, %v82_v48  ;;  %v278_v50 = vmul.u32.u64.high %v83_v31, %v82_v48, %v277_v49  ;;  %v280_v51 = vmul.u32.u64.low %v83_v31, %v78_v47  ;;  %v281_v52 = vmul.u32.u64.high %v83_v31, %v78_v47, %v280_v51 }
  0x31   :  { %vm92_vm5 = vc.u32 %v278_v50, %v280_v51  ;;  %v93_v54 = vadd.s32 1, %v281_v52  ;;  %v91_v1 = vadd.s32 %v280_v51, %v278_v50 }
  0x33   :  { %v94_v55 = vsel %vm92_vm5, %v93_v54, %v281_v52 }
  0x34   :  { %v95_v56 = vadd.s32 %v94_v55, %v90_v53 }
  0x36   :  { %v96_v57 = vadd.s32 536870912, %v95_v56 }
  0x38   :  { %v97_v58 = vshrl.u32 %v96_v57, 30 }
  0x3a   :  { %v98_v59 = vshll.u32 %v97_v58, 30  ;;  %v121_v15 = vsub.s32 4, %v97_v58 }
  0x3c   :  { %v99_v60 = vsub.s32 %v95_v56, %v98_v59  ;;  %v122_v18 = vsel %vm37_vm7, %v121_v15, %v97_v58 }
  0x3d   :  { %v124_v21 = vsel %vm36_vm8, 0, %v122_v18 }
  0x3e   :  { %v101_v61 = vsub.s32 0, %v99_v60  ;;  %v128_v22 = vadd.s32 3, %v124_v21 }
  0x40   :  { %v159_v62 = vmin.u32 %v101_v61, %v99_v60  ;;  %v129_v23 = vand.u32 3, %v128_v22 }
  0x42   :  { %v103_v63 = vclz %v159_v62  ;;  %vm134_vm9 = vcmp.eq.s32.totalorder %v129_v23, 2  ;;  %vm131_vm10 = vcmp.eq.s32.totalorder %v129_v23, 0  ;;  %vm130_vm11 = vcmp.lt.s32.totalorder %v129_v23, 2 }
  0x44   :  { %v160_v0 = vadd.s32 4294967294, %v103_v63 }
  0x46   :  { %vm161_vm6 = vcmp.lt.s32.totalorder %v160_v0, 0 }
  0x47   :  { %v106_v3 = vsel %vm161_vm6, 0, %v160_v0 }
  0x48   :  { %v107_v4 = vsub.s32 32, %v106_v3  ;;  %v108_v6 = vshll.u32 %v99_v60, %v106_v3  ;;  %v111_v7 = vsub.s32 4294967266, %v106_v3 }
  0x4a   :  { %v109_v8 = vshrl.u32 %v91_v1, %v107_v4  ;;  %v112_v9 = vadd.s32 127, %v111_v7 }
  0x4c   :  { %v110_v10 = vor.u32 %v109_v8, %v108_v6  ;;  %v113_v11 = vshll.u32 %v112_v9, 23 }
  0x4e   :  { %v114_v12 = vor.u32 4788187, %v113_v11  ;;  %v117_v13 = vcvt.s32.f32 %v110_v10 }
  0x50   :  { %v115_v14 = vand.u32 2147483647, %v114_v12 }
  0x52   :  { %v118_v16 = vmul.f32 %v117_v13, %v115_v14 }
  0x54   :  { %v119_v17 = vxor.u32 2147483648, %v118_v16 }
  0x56   :  { %v120_v19 = vsel %vm37_vm7, %v119_v17, %v118_v16 }
  0x57   :  { %v123_v20 = vsel %vm36_vm8, %v271_v2, %v120_v19 }
  0x58   :  { %176 = vcosq.f32 %v123_v20 }
  0x59   :  { %178 = vsinq.f32 %v123_v20 }
  0x62   :  { %v177_v24 = vpop.eup %176 }
  0x63   :  { %v179_v25 = vpop.eup %178  ;;  %v135_v26 = vxor.u32 2147483648, %v177_v24 }
  0x64   :  { %v132_v27 = vxor.u32 2147483648, %v179_v25 }
  0x65   :  { %v136_v5 = vsel %vm134_vm9, %v135_v26, %v179_v25 }
  0x66   :  { %v133_v28 = vsel %vm131_vm10, %v177_v24, %v132_v27 }
  0x67   :  { %v137_v29 = vsel %vm130_vm11, %v133_v28, %v136_v5 }
  0x68   :  { %v138_v30 = vsel %vm127_vm12, nan, %v137_v29 }
  0x69   :  { %139 = vst [vmem:[#allocation5] sm:$0xff] %v138_v30 }
  0x6a   :  { %144 = vsyncadd [#allocation4], 64  ;;  %s237_s0 = smov [#allocation5]  }
  0x6b   :  { %s145_s1 = sshll.u32 %s237_s0, 4  ;;  %s146_s1 = int_to_ptr.vmem [resolvable:$true] %s145_s1 }
  0x6c   :  { %s202_s26 = scalar_lea.vmem %s146_s1, 64  ;;  %s206_s27 = scalar_lea.vmem %s146_s1, 128 }
  0x6d   :  { %p203_p8 = scmp.ne.s32.totalorder %s146_s1, %s202_s26  ;;  %p207_p9 = scmp.lt.s32.totalorder %s146_s1, %s146_s1 }
  0x6e   :  { %p208_p10 = scmp.lt.s32.totalorder %s206_s27, %s202_s26 }
  0x70   :  { %p209_p11 = por %p208_p10, %p207_p9 }
  0x72   :  { %p210_p12 = pnand %p209_p11, %p203_p8 }
  0x74   :  { %213 = shalt.err (!%p210_p12)
}
  0x75   :  { %s214_s30 = scalar_lea.hbm %s309_s2, 64 }
  0x76   :  { %p215_p13 = scmp.ne.s32.totalorder %s309_s2, %s214_s30  ;;  %p218_p0 = scmp.lt.u32.totalorder %s214_s30, %s309_s2 }
  0x78   :  { %p220_p1 = pnand %p218_p0, %p215_p13 }
  0x7a   :  { %223 = shalt.err (!%p220_p1)
}
  0x7b   :  { %151 = dma.vmem_to_hbm [thread:$0]  %s146_s1, 64, %s309_s2, [#allocation4], %s229_s20, %s229_s20, %s230_s21  }
  0x7c   :  { %226 = dma.done.wait [#allocation4], 128  }
  0x7d   :  { %227 = vsyncadd [#allocation4], 4294967168 }
  0x7e   :  { %155 = vsyncpa [#allocation3], 1 }
  0x7f   :  { %156 = vsyncpa [#allocation4], 1 }

</bundles_post_ra>
